<compile_context>
chip_gen: v7x
topology: tpu7x:2x2x1
jax: 0.10.0
libtpu: 0.0.40
codegen_flags: <defaults>
</compile_context>

<pallas_src>
import jax
import jax.numpy as jnp
from jax.experimental import pallas as pl
from jax.experimental.pallas import tpu as pltpu

LANE = 128


def _round_up(x, m):
    return ((x + m - 1) // m) * m


def note_encoder_kernel(feat_ref, types_ref, wt_ref, embb_ref, out_ref):
    # feat_ref : (TILE_N, input_dim)   f32
    # types_ref: (TILE_N, 1)           i32
    # wt_ref   : (input_dim, d_model)  f32   (transposed Linear weight)
    # embb_ref : (num_types, d_model)  f32   (embedding table, Linear bias folded in)
    # out_ref  : (TILE_N, d_model)     f32 or bf16
    x = feat_ref[...]
    proj = jnp.dot(x, wt_ref[...], preferred_element_type=jnp.float32)

    t = types_ref[...]                                   # (TILE_N, 1) i32
    num_types = embb_ref.shape[0]
    rows = t.shape[0]
    # one-hot(types) via 2-D iota, applied as a tiny-K matmul on the MXU.
    # Note: out-of-range ids contribute zero (PyTorch nn.Embedding would error).
    type_ids = jax.lax.broadcasted_iota(jnp.int32, (rows, num_types), 1)
    onehot = (t == type_ids).astype(jnp.float32)         # (TILE_N, num_types)
    emb = jnp.dot(onehot, embb_ref[...], preferred_element_type=jnp.float32)

    out_ref[...] = (proj + emb).astype(out_ref.dtype)


def note_encoder_forward(features, note_types, w, b, emb_table, *,
                         tile_n=8192, min_grid_steps=4, out_dtype=jnp.float32):
    """features : (seq_len, batch, input_dim) f32
       note_types: (seq_len, batch) int
       w         : (d_model, input_dim)   (PyTorch Linear weight layout)
       b         : (d_model,)
       emb_table : (num_types, d_model)
       out_dtype : jnp.float32 (exact PyTorch parity) or jnp.bfloat16
                   (halves the dominant HBM write; f32 accumulation kept).
       returns   : (seq_len, batch, d_model) out_dtype
    """
    seq_len, batch, input_dim = features.shape
    d_model = w.shape[0]
    num_types = emb_table.shape[0]
    n = seq_len * batch

    out_itemsize = jnp.dtype(out_dtype).itemsize
    row_align = 8 if out_itemsize == 4 else 16        # bf16 output packs 16 sublanes

    # ---- tile size: big enough to amortize per-step overhead, small enough to
    # ---- leave >= min_grid_steps steps (overlap + v7x dual-TC) for large N.
    n_al = _round_up(n, row_align)
    tn = min(_round_up(tile_n, row_align), n_al)
    if n_al >= min_grid_steps * 512:                  # never shrink below 512 rows/step
        tn = min(tn, _round_up(pl.cdiv(n_al, min_grid_steps), row_align))
    tn = max(tn, row_align)
    grid = (pl.cdiv(n, tn),)

    feat2d = features.reshape(n, input_dim)
    if feat2d.dtype != jnp.float32:
        feat2d = feat2d.astype(jnp.float32)
    types2d = note_types.reshape(n, 1)
    if types2d.dtype != jnp.int32:
        types2d = types2d.astype(jnp.int32)
    wt = w.T
    if wt.dtype != jnp.float32:
        wt = wt.astype(jnp.float32)
    # Fold the Linear bias into the embedding table (exactly one emb row per token).
    emb_plus_b = emb_table.astype(jnp.float32) + b.astype(jnp.float32)[None, :]

    # ---- VMEM budget: double-buffered, lane-padded blocks + margin.
    per_buf = (tn * _round_up(input_dim, LANE) * 4      # feat block (lanes 10->128)
               + tn * _round_up(1, LANE) * 4            # types block (lanes 1->128)
               + tn * _round_up(d_model, LANE) * out_itemsize)
    weight_bytes = (_round_up(input_dim, 8) * _round_up(d_model, LANE)
                    + _round_up(num_types, 8) * _round_up(d_model, LANE)) * 4
    vmem_limit = 2 * per_buf + 2 * weight_bytes + (8 << 20)
    vmem_limit = min(max(vmem_limit, 16 << 20), 64 << 20)   # stay inside v7x physical

    out2d = pl.pallas_call(
        note_encoder_kernel,
        out_shape=jax.ShapeDtypeStruct((n, d_model), out_dtype),
        grid=grid,
        in_specs=[
            pl.BlockSpec((tn, input_dim), lambda i: (i, 0)),
            pl.BlockSpec((tn, 1), lambda i: (i, 0)),
            pl.BlockSpec((input_dim, d_model), lambda i: (0, 0)),
            pl.BlockSpec((num_types, d_model), lambda i: (0, 0)),
        ],
        out_specs=pl.BlockSpec((tn, d_model), lambda i: (i, 0)),
        compiler_params=pltpu.CompilerParams(
            dimension_semantics=("parallel",),
            vmem_limit_bytes=int(vmem_limit)),
    )(feat2d, types2d, wt, emb_plus_b)

    return out2d.reshape(seq_len, batch, d_model)


if __name__ == "__main__":
    # Module hyperparameters (from NoteEncoder.__init__)
    input_dim = 10
    d_model = 128
    num_types = 6

    # Small example shapes consistent with forward(): (seq_len, batch, input_dim)
    seq_len, batch = 8, 2

    key = jax.random.PRNGKey(0)
    k_feat, k_types, k_w, k_b, k_emb = jax.random.split(key, 5)

    features = jax.random.normal(k_feat, (seq_len, batch, input_dim), dtype=jnp.float32)
    note_types = jax.random.randint(k_types, (seq_len, batch), 0, num_types, dtype=jnp.int32)

    # Deterministic synthetic parameters (PyTorch Linear weight layout: (d_model, input_dim))
    w = jax.random.normal(k_w, (d_model, input_dim), dtype=jnp.float32) * 0.1
    b = jax.random.normal(k_b, (d_model,), dtype=jnp.float32) * 0.1
    emb_table = jax.random.normal(k_emb, (num_types, d_model), dtype=jnp.float32) * 0.1

    # Pure-JAX reference (Linear + embedding lookup)
    ref = jnp.einsum("sbi,di->sbd", features, w) + b[None, None, :] + emb_table[note_types]

    # Default path: f32 output, exact PyTorch semantics.
    out = note_encoder_forward(features, note_types, w, b, emb_table)
    out = jax.block_until_ready(out)
    assert out.shape == (seq_len, batch, d_model)
    assert out.dtype == jnp.float32
    assert jnp.allclose(out, ref, atol=1e-4, rtol=1e-4)

    # Reduced-HBM path: bf16 output (f32 accumulation, cast at the final store).
    out_bf16 = note_encoder_forward(features, note_types, w, b, emb_table,
                                    out_dtype=jnp.bfloat16)
    out_bf16 = jax.block_until_ready(out_bf16)
    assert out_bf16.dtype == jnp.bfloat16
    assert jnp.allclose(out_bf16.astype(jnp.float32), ref, atol=3e-2, rtol=3e-2)

    print("KERNEL_OK")
</pallas_src>

<mosaic_0001>
module attributes {stable_mosaic.version = 11 : i64} {
  func.func @note_encoder_kernel(%arg0: i32, %arg1: memref<16x10xf32, #tpu.memory_space<vmem>>, %arg2: memref<16x1xi32, #tpu.memory_space<vmem>>, %arg3: memref<10x128xf32, #tpu.memory_space<vmem>>, %arg4: memref<6x128xf32, #tpu.memory_space<vmem>>, %arg5: memref<16x128xf32, #tpu.memory_space<vmem>>) attributes {dimension_semantics = [#tpu.dimension_semantics<parallel>], iteration_bounds = array<i64: 1>, scalar_prefetch = 0 : i64, scratch_operands = 0 : i64, tpu.core_type = #tpu.core_type<tc>, window_params = [{transform_indices = @transform_0, window_bounds = array<i64: 16, 10>}, {transform_indices = @transform_1, window_bounds = array<i64: 16, 1>}, {pipeline_mode = #tpu.pipeline_mode<synchronous>, transform_indices = @transform_2, window_bounds = array<i64: 10, 128>}, {pipeline_mode = #tpu.pipeline_mode<synchronous>, transform_indices = @transform_3, window_bounds = array<i64: 6, 128>}, {transform_indices = @transform_4, window_bounds = array<i64: 16, 128>}]} {
    %c0 = arith.constant 0 : index
    %c0_0 = arith.constant 0 : index
    %0 = vector.load %arg1[%c0, %c0_0] : memref<16x10xf32, #tpu.memory_space<vmem>>, vector<16x10xf32>
    %c0_1 = arith.constant 0 : index
    %c0_2 = arith.constant 0 : index
    %1 = vector.load %arg3[%c0_1, %c0_2] : memref<10x128xf32, #tpu.memory_space<vmem>>, vector<10x128xf32>
    %cst = arith.constant dense<0.000000e+00> : vector<16x128xf32>
    %2 = tpu.matmul %0, %1, %cst {dimension_numbers = #tpu.dot_dimension_numbers<[1], [0], [0], [1], [0, 0, 1, 1], [], []>} : vector<16x10xf32>, vector<10x128xf32>, vector<16x128xf32> -> vector<16x128xf32>
    %c0_3 = arith.constant 0 : index
    %c0_4 = arith.constant 0 : index
    %3 = vector.load %arg2[%c0_3, %c0_4] : memref<16x1xi32, #tpu.memory_space<vmem>>, vector<16x1xi32>
    %4 = tpu.iota {dimensions = array<i32: 1>} : vector<16x6xi32>
    %5 = vector.broadcast %3 : vector<16x1xi32> to vector<16x6xi32>
    %6 = arith.cmpi eq, %5, %4 : vector<16x6xi32>
    %7 = arith.extui %6 : vector<16x6xi1> to vector<16x6xi32>
    %8 = arith.sitofp %7 : vector<16x6xi32> to vector<16x6xf32>
    %c0_5 = arith.constant 0 : index
    %c0_6 = arith.constant 0 : index
    %9 = vector.load %arg4[%c0_5, %c0_6] : memref<6x128xf32, #tpu.memory_space<vmem>>, vector<6x128xf32>
    %cst_7 = arith.constant dense<0.000000e+00> : vector<16x128xf32>
    %10 = tpu.matmul %8, %9, %cst_7 {dimension_numbers = #tpu.dot_dimension_numbers<[1], [0], [0], [1], [0, 0, 1, 1], [], []>} : vector<16x6xf32>, vector<6x128xf32>, vector<16x128xf32> -> vector<16x128xf32>
    %11 = arith.addf %2, %10 : vector<16x128xf32>
    %c0_8 = arith.constant 0 : index
    %c0_9 = arith.constant 0 : index
    %12 = vector.load %arg5[%c0_8, %c0_9] : memref<16x128xf32, #tpu.memory_space<vmem>>, vector<16x128xf32>
    tpu.vector_store %arg5[%c0_8, %c0_9], %11 {strides = array<i32>} : memref<16x128xf32, #tpu.memory_space<vmem>>, vector<16x128xf32>,
    return
  }
  func.func @transform_0(%arg0: i32) -> (i32, i32) {
    %c0_i32 = arith.constant 0 : i32
    %c0_i32_0 = arith.constant 0 : i32
    return %arg0, %c0_i32 : i32, i32
  }
  func.func @transform_1(%arg0: i32) -> (i32, i32) {
    %c0_i32 = arith.constant 0 : i32
    %c0_i32_0 = arith.constant 0 : i32
    return %arg0, %c0_i32 : i32, i32
  }
  func.func @transform_2(%arg0: i32) -> (i32, i32) {
    %c0_i32 = arith.constant 0 : i32
    %c0_i32_0 = arith.constant 0 : i32
    %c0_i32_1 = arith.constant 0 : i32
    return %c0_i32, %c0_i32_0 : i32, i32
  }
  func.func @transform_3(%arg0: i32) -> (i32, i32) {
    %c0_i32 = arith.constant 0 : i32
    %c0_i32_0 = arith.constant 0 : i32
    %c0_i32_1 = arith.constant 0 : i32
    return %c0_i32, %c0_i32_0 : i32, i32
  }
  func.func @transform_4(%arg0: i32) -> (i32, i32) {
    %c0_i32 = arith.constant 0 : i32
    %c0_i32_0 = arith.constant 0 : i32
    return %arg0, %c0_i32 : i32, i32
  }
}

</mosaic_0001>

<bundles_post_ra>
// kernel: tpu_custom_call.1
= control target key start
LH: loop header
LB: loop body
LE: loop exit
PB: predicated region body
PF: predicated region fallthrough
CT: control target
= control target key end

     0   :  { %9 = vsyncpa [#allocation3], 0  ;;  %s412_s0 = inlined_call_operand.vmem [shape: f32[16,10], index: 0, kind: input, shape index: {}]   ;;  %s413_s1 = inlined_call_operand.vmem [shape: s32[16,1], index: 1, kind: input, shape index: {}]   ;;  %s414_s2 = inlined_call_operand.hbm [shape: f32[10,128], index: 2, kind: input, shape index: {}]   ;;  %s415_s3 = inlined_call_operand.vmem [shape: f32[6,128], index: 3, kind: input, shape index: {}]   ;;  %s416_s4 = inlined_call_operand.hbm [shape: f32[16,128], index: 4, kind: output, shape index: {}]  }
   0x1   :  { %10 = vsyncpa [#allocation4], 0  ;;  %s335_s15 = smov [#allocation2]   ;;  %s287_s19 = scalar_lea.hbm %s414_s2, 256 }
   0x2   :  { %s20_s16 = sshll.u32 %s335_s15, 4  ;;  %p288_p0 = scmp.ne.s32.totalorder %s414_s2, %s287_s19  ;;  %s21_s16 = int_to_ptr.vmem [resolvable:$true] %s20_s16 }
   0x3   :  { %p291_p1 = scmp.lt.u32.totalorder %s287_s19, %s414_s2 }
   0x5   :  { %p293_p2 = pnand %p291_p1, %p288_p0 }
   0x7   :  { %296 = shalt.err (!%p293_p2)
}
   0x8   :  { %s297_s24 = scalar_lea.vmem %s21_s16, 256  ;;  %p302_p4 = scmp.lt.s32.totalorder %s21_s16, %s21_s16 }
   0x9   :  { %p298_p3 = scmp.ne.s32.totalorder %s21_s16, %s297_s24  ;;  %p303_p5 = scmp.lt.s32.totalorder %s297_s24, %s297_s24 }
   0xb   :  { %p304_p6 = por %p303_p5, %p302_p4 }
   0xd   :  { %p305_p7 = pnand %p304_p6, %p298_p3 }
   0xf   :  { %308 = shalt.err (!%p305_p7)
}
  0x10   :  { %s336_s25 = smov 128   ;;  %s337_s26 = smov 8  }
  0x11   :  { %26 = dma.hbm_to_vmem [thread:$0]  %s414_s2, 256, %s21_s16, [#allocation3], %s336_s25, %s336_s25, %s337_s26  }
  0x12   :  { %331 = dma.done.wait [#allocation3], 256  }
  0x13   :  { %332 = vsyncadd [#allocation3], 4294967040  ;;  %v338_v0 = vmov 0   ;;  %v36_v1 = vld [vmem:[%s413_s1] sm:$0xff]  ;;  %vm146_vm0 = vcmask 1041408   ;;  %vm339_vm1 = vmmov 1   ;;  %v38_v9 = vlaneseq }
  0x14   :  { %286 = vset.pattern.permute.xlu0 %v338_v0  ;;  %v34_v2 = vld [vmem:[#allocation2] sm:$0xff]  ;;  %v35_v3 = vld [vmem:[#allocation2 + $0x8] sm:$0x3]  ;;  %vm272_vm2 = vmpackc.low %vm146_vm0, %vm339_vm1  ;;  %vm60_vm3 = vcmask 1045504   ;;  %vm139_vm4 = vcmask 80896   ;;  %vm53_vm5 = vcmask 48128  }
  0x15   :  { %41 = vperm.xlu0 %286, %v36_v1   ;;  %v37_v4 = vld [vmem:[%s413_s1 + $0x8] sm:$0xff]  ;;  %v271_v5 = vpack.c.bf16 %v35_v3, %v34_v2  ;;  %v52_v6 = vld [vmem:[%s415_s3] sm:$0x3f]  ;;  %v39_v10 = vand.u32 127, %v38_v9  ;;  %v340_v12 = vmov 0.0   ;;  %s341_s1 = smov [#allocation5]  }
  0x16   :  { %v32_v7 = vld [vmem:[%s412_s0] sm:$0xff]  ;;  %v33_v8 = vld [vmem:[%s412_s0 + $0x8] sm:$0xff]  ;;  %259 = vmatprep.subr.msk.mxu1 %vm60_vm3, %v52_v6  ;;  %s232_s0 = sshll.u32 %s341_s1, 4  ;;  %s233_s0 = int_to_ptr.vmem [resolvable:$true] %s232_s0 }
  0x17   :  { %273 = vmatprep.subr.msk.bf16.mxu0 %vm272_vm2, %v271_v5  ;;  %268 = vmatprep.mubr.msk.f32.mxu0 %vm139_vm4, %v32_v7  ;;  %s309_s3 = scalar_lea.vmem %s233_s0, 256  ;;  %p314_p9 = scmp.lt.s32.totalorder %s233_s0, %s233_s0 }
  0x18   :  { %276 = vmatpush3.bf16.msk.msra.mxu0 %vm272_vm2, %v271_v5  ;;  %260 = vmatpush3.msk.msra.mxu1 %vm60_vm3, %v52_v6  ;;  %p310_p8 = scmp.ne.s32.totalorder %s233_s0, %s309_s3  ;;  %p315_p10 = scmp.lt.s32.totalorder %s309_s3, %s309_s3 }
  0x19   :  { %44 = vperm.xlu0 %286, %v37_v4  }
  0x1a   :  { %p316_p11 = por %p315_p10, %p314_p9 }
  0x1b   :  { %269 = vmatmul.mubr.msk.f32.vlgmr.msra.gmra.mrb[0].mxu0 %vm139_vm4, %v33_v8 }
  0x1c   :  { %p317_p12 = pnand %p316_p11, %p310_p8 }
  0x94   :  { %v42_v11 = vpop.permute.xlu0 %41 }
  0x95   :  { %vm46_vm6 = vcmp.eq.s32.totalorder %v42_v11, %v39_v10 }
  0x96   :  { %v244_v13 = vsel %vm46_vm6, 1.0, %v340_v12 }
  0x97   :  { %261 = vmatprep.mubr.msk.f32.mxu1 %vm53_vm5, %v244_v13 }
  0x98   :  { %v45_v14 = vpop.permute.xlu0 %44 }
  0x99   :  { %vm47_vm7 = vcmp.eq.s32.totalorder %v45_v14, %v39_v10 }
  0x9a   :  { %v245_v15 = vsel %vm47_vm7, 1.0, %v340_v12 }
  0x9b   :  { %262 = vmatmul.mubr.msk.f32.vlgmr.msra.gmra.mrb[0].mxu1 %vm53_vm5, %v245_v15 }
  0xee   :  { %v270_v16 = vpop.f32.mrb[0].mxu0 }
  0xef   :  { %v216_v17 = vpop.f32.mrb[1].mxu0 }
 0x16e   :  { %v263_v18 = vpop.f32.mrb[0].mxu1 }
 0x16f   :  { %v222_v19 = vadd.f32 %v270_v16, %v263_v18  ;;  %v130_v20 = vpop.f32.mrb[1].mxu1 }
 0x170   :  { %v217_v21 = vadd.f32 %v216_v17, %v130_v20 }
 0x171   :  { %226 = vst [vmem:[#allocation5 + $0x8] sm:$0xff] %v222_v19 }
 0x172   :  { %225 = vst [vmem:[#allocation5] sm:$0xff] %v217_v21 }
 0x173   :  { %320 = shalt.err (!%p317_p12)
}
 0x174   :  { %s321_s14 = scalar_lea.hbm %s416_s4, 256 }
 0x175   :  { %p322_p13 = scmp.ne.s32.totalorder %s416_s4, %s321_s14  ;;  %p325_p0 = scmp.lt.u32.totalorder %s321_s14, %s416_s4 }
 0x177   :  { %p327_p1 = pnand %p325_p0, %p322_p13 }
 0x179   :  { %330 = shalt.err (!%p327_p1)
}
 0x17a   :  { %238 = dma.vmem_to_hbm [thread:$0]  %s233_s0, 256, %s416_s4, [#allocation4], %s336_s25, %s336_s25, %s337_s26  }
 0x17b   :  { %333 = dma.done.wait [#allocation4], 256  }
 0x17c   :  { %334 = vsyncadd [#allocation4], 4294967040 }
 0x17d   :  { %242 = vsyncpa [#allocation3], 1 }
 0x17e   :  { %243 = vsyncpa [#allocation4], 1 }

</bundles_post_ra>
